<compile_context>
chip_gen: v6e
topology: v6e:2x2x1
jax: 0.10.0
libtpu: 0.0.40
codegen_flags: <defaults>
</compile_context>

<pallas_src>
import math

import jax
import jax.numpy as jnp
from jax.experimental import pallas as pl
from jax.experimental.pallas import tpu as pltpu

# Lane-aligned (multiple-of-128) padded hidden widths: 400 -> 512, 300 -> 384.
H1, H2 = 512, 384
TB_MAX = 1024   # max batch-tile rows; working set stays well under VMEM limits


def _act_dtype():
    """bf16 elementwise math on bf16-capable VPUs (v6e/v7x), f32 otherwise."""
    try:
        kind = jax.devices()[0].device_kind.lower()
    except Exception:
        kind = ""
    return jnp.bfloat16 if ("v6" in kind or "v7" in kind) else jnp.float32


def ddpg_kernel(dv_ref, w1d_ref, w1v_ref, b1_ref, w2_ref, b2_ref,
                w3_ref, b3_ref, o_ref):
    act_dt = w1d_ref.dtype

    # Layer 1 (in_features = 2): two broadcast FMAs on the VPU instead of a
    # K=2 MXU matmul.
    d = dv_ref[:, 0:1].astype(act_dt)
    v = dv_ref[:, 1:2].astype(act_dt)
    h1 = jnp.maximum(d * w1d_ref[...] + v * w1v_ref[...] + b1_ref[...], 0.0)

    # Layer 2: bf16 operands into the MXU; bias/ReLU in the activation dtype.
    h2 = jnp.dot(h1.astype(w2_ref.dtype), w2_ref[...],
                 preferred_element_type=act_dt) + b2_ref[...]
    h2 = jnp.maximum(h2, 0.0)                                   # [TB, 384]

    # Layer 3 (out_features = 1): VPU multiply + lane reduction -> [TB, 1] f32.
    # The 0.5*x + 0.5 affine is folded into w3/b3 offline; the module's
    # double-ReLU trick == clamp to [0, 1].
    h3 = jnp.sum(h2.astype(jnp.float32) * w3_ref[...], axis=-1,
                 keepdims=True) + b3_ref[...]
    o_ref[...] = jnp.clip(h3, 0.0, 1.0).astype(o_ref.dtype)


def _round_up(x, m):
    return (x + m - 1) // m * m


def ddpg_forward(d, v, kparams):
    """d, v: [B, 1] float32.  Returns [B, 1] float32 clamped to [0, 1]."""
    w1d, w1v, b1, w2, b2, w3, b3 = kparams
    B = d.shape[0]

    # Adaptive batch tiling: big tiles at large B (amortize per-step overhead),
    # bounded padding waste, and always >= 2 grid steps so both v7x
    # TensorCores get work on the "parallel" batch axis.
    n_steps = max(2, pl.cdiv(B, TB_MAX))
    TB = _round_up(pl.cdiv(B, n_steps), 8)
    B_pad = n_steps * TB

    dv = jnp.concatenate((d, v), axis=1)            # [B, 2] f32
    if B_pad != B:
        dv = jnp.pad(dv, ((0, B_pad - B), (0, 0)))

    def const_spec(arr):
        # Constant block index: weights/biases stay VMEM-resident across steps.
        return pl.BlockSpec(arr.shape, lambda i: (0, 0))

    out = pl.pallas_call(
        ddpg_kernel,
        out_shape=jax.ShapeDtypeStruct((B_pad, 1), jnp.float32),
        grid=(n_steps,),
        in_specs=[pl.BlockSpec((TB, 2), lambda i: (i, 0)),
                  const_spec(w1d), const_spec(w1v), const_spec(b1),
                  const_spec(w2), const_spec(b2),
                  const_spec(w3), const_spec(b3)],
        out_specs=pl.BlockSpec((TB, 1), lambda i: (i, 0)),
        compiler_params=pltpu.CompilerParams(
            dimension_semantics=("parallel",)),
    )(dv, w1d, w1v, b1, w2, b2, w3, b3)

    # Padded rows (B_pad > B) carry garbage and are sliced off here.
    return out[:B]


def init_params(key):
    """Unpadded f32 params matching nn.Linear(2,400)/(400,300)/(300,1)."""
    dims = [(2, 400), (400, 300), (300, 1)]
    raw = []
    for fan_in, fan_out in dims:
        key, kw, kb = jax.random.split(key, 3)
        bound = float(1.0 / math.sqrt(fan_in))  # PyTorch Linear default init
        w = jax.random.uniform(kw, (fan_in, fan_out), jnp.float32, -bound, bound)
        b = jax.random.uniform(kb, (fan_out,), jnp.float32, -bound, bound)
        raw.append((w, b))
    return raw


def pack_params(raw, act_dtype):
    """Lane-pad, fold 0.5*x+0.5 into layer 3, cast per device generation."""
    (w1, b1), (w2, b2), (w3, b3) = raw

    # Fold the 0.5*x + 0.5 affine into the last layer (0.5 scale is exact).
    w3 = 0.5 * w3
    b3 = 0.5 * b3 + 0.5

    w1p = jnp.zeros((2, H1), jnp.float32).at[:, :400].set(w1)
    w1d = w1p[0:1, :].astype(act_dtype)     # d-row of W1
    w1v = w1p[1:2, :].astype(act_dtype)     # v-row of W1
    b1p = jnp.zeros((1, H1), jnp.float32).at[:, :400].set(b1).astype(act_dtype)

    w2p = jnp.zeros((H1, H2), jnp.float32).at[:400, :300].set(w2).astype(jnp.bfloat16)
    b2p = jnp.zeros((1, H2), jnp.float32).at[:, :300].set(b2).astype(act_dtype)

    # Layer 3 as a single f32 row: kernel does a VPU multiply + lane reduce.
    w3p = jnp.zeros((1, H2), jnp.float32).at[0, :300].set(w3[:, 0])
    b3p = b3.reshape(1, 1).astype(jnp.float32)
    return (w1d, w1v, b1p, w2p, b2p, w3p, b3p)


if __name__ == "__main__":
    key = jax.random.PRNGKey(0)
    kp, kd, kv = jax.random.split(key, 3)

    raw = init_params(kp)
    act_dt = _act_dtype()
    kparams = pack_params(raw, act_dt)

    B = 8
    d = jax.random.normal(kd, (B, 1), jnp.float32)
    v = jax.random.normal(kv, (B, 1), jnp.float32)

    out = jax.block_until_ready(ddpg_forward(d, v, kparams))
    assert out.shape == (B, 1), out.shape

    # Reference 1: mirror the kernel's exact dtype/padding choices in plain JAX.
    w1d, w1v, b1p, w2p, b2p, w3p, b3p = kparams
    dm, vm = d.astype(act_dt), v.astype(act_dt)
    h1 = jnp.maximum(dm * w1d + vm * w1v + b1p, 0.0)
    h2 = jnp.maximum(jnp.dot(h1.astype(jnp.bfloat16), w2p,
                             preferred_element_type=act_dt) + b2p, 0.0)
    h3 = jnp.sum(h2.astype(jnp.float32) * w3p, axis=-1, keepdims=True) + b3p
    ref_mirror = jnp.clip(h3, 0.0, 1.0)
    assert jnp.allclose(out, ref_mirror, atol=1e-2), (out, ref_mirror)

    # Reference 2: the original full-f32 PyTorch module semantics (loose tol
    # accounts for the bf16 weight / activation / input casts).
    (w1, b1), (w2, b2), (w3, b3) = raw
    x = jnp.concatenate((d, v), axis=1)
    h = jnp.maximum(x @ w1 + b1, 0.0)
    h = jnp.maximum(h @ w2 + b2, 0.0)
    h = h @ w3 + b3
    ref_f32 = jnp.clip(0.5 * h + 0.5, 0.0, 1.0)
    assert jnp.allclose(out, ref_f32, atol=3e-2), (out, ref_f32)

    print("KERNEL_OK")
</pallas_src>

<mosaic_0001>
module attributes {stable_mosaic.version = 11 : i64} {
  func.func @ddpg_kernel(%arg0: i32, %arg1: memref<8x2xf32, #tpu.memory_space<vmem>>, %arg2: memref<1x512xf32, #tpu.memory_space<vmem>>, %arg3: memref<1x512xf32, #tpu.memory_space<vmem>>, %arg4: memref<1x512xf32, #tpu.memory_space<vmem>>, %arg5: memref<512x384xbf16, #tpu.memory_space<vmem>>, %arg6: memref<1x384xf32, #tpu.memory_space<vmem>>, %arg7: memref<1x384xf32, #tpu.memory_space<vmem>>, %arg8: memref<1x1xf32, #tpu.memory_space<vmem>>, %arg9: memref<8x1xf32, #tpu.memory_space<vmem>>) attributes {dimension_semantics = [#tpu.dimension_semantics<parallel>], iteration_bounds = array<i64: 2>, scalar_prefetch = 0 : i64, scratch_operands = 0 : i64, tpu.core_type = #tpu.core_type<tc>, window_params = [{transform_indices = @transform_0, window_bounds = array<i64: 8, 2>}, {pipeline_mode = #tpu.pipeline_mode<synchronous>, transform_indices = @transform_1, window_bounds = array<i64: 1, 512>}, {pipeline_mode = #tpu.pipeline_mode<synchronous>, transform_indices = @transform_2, window_bounds = array<i64: 1, 512>}, {pipeline_mode = #tpu.pipeline_mode<synchronous>, transform_indices = @transform_3, window_bounds = array<i64: 1, 512>}, {pipeline_mode = #tpu.pipeline_mode<synchronous>, transform_indices = @transform_4, window_bounds = array<i64: 512, 384>}, {pipeline_mode = #tpu.pipeline_mode<synchronous>, transform_indices = @transform_5, window_bounds = array<i64: 1, 384>}, {pipeline_mode = #tpu.pipeline_mode<synchronous>, transform_indices = @transform_6, window_bounds = array<i64: 1, 384>}, {pipeline_mode = #tpu.pipeline_mode<synchronous>, transform_indices = @transform_7, window_bounds = array<i64: 1, 1>}, {transform_indices = @transform_8, window_bounds = array<i64: 8, 1>}]} {
    %c0 = arith.constant 0 : index
    %c0_0 = arith.constant 0 : index
    %0 = vector.load %arg1[%c0, %c0_0] : memref<8x2xf32, #tpu.memory_space<vmem>>, vector<8x1xf32>
    %c0_1 = arith.constant 0 : index
    %c1 = arith.constant 1 : index
    %1 = vector.load %arg1[%c0_1, %c1] : memref<8x2xf32, #tpu.memory_space<vmem>>, vector<8x1xf32>
    %c0_2 = arith.constant 0 : index
    %c0_3 = arith.constant 0 : index
    %2 = vector.load %arg2[%c0_2, %c0_3] : memref<1x512xf32, #tpu.memory_space<vmem>>, vector<1x512xf32>
    %3 = vector.broadcast %0 : vector<8x1xf32> to vector<8x512xf32>
    %4 = vector.broadcast %2 : vector<1x512xf32> to vector<8x512xf32>
    %5 = arith.mulf %3, %4 : vector<8x512xf32>
    %c0_4 = arith.constant 0 : index
    %c0_5 = arith.constant 0 : index
    %6 = vector.load %arg3[%c0_4, %c0_5] : memref<1x512xf32, #tpu.memory_space<vmem>>, vector<1x512xf32>
    %7 = vector.broadcast %1 : vector<8x1xf32> to vector<8x512xf32>
    %8 = vector.broadcast %6 : vector<1x512xf32> to vector<8x512xf32>
    %9 = arith.mulf %7, %8 : vector<8x512xf32>
    %10 = arith.addf %5, %9 : vector<8x512xf32>
    %c0_6 = arith.constant 0 : index
    %c0_7 = arith.constant 0 : index
    %11 = vector.load %arg4[%c0_6, %c0_7] : memref<1x512xf32, #tpu.memory_space<vmem>>, vector<1x512xf32>
    %12 = vector.broadcast %11 : vector<1x512xf32> to vector<8x512xf32>
    %13 = arith.addf %10, %12 : vector<8x512xf32>
    %cst = arith.constant 0.000000e+00 : f32
    %14 = vector.broadcast %cst : f32 to vector<8x512xf32>
    %15 = arith.maximumf %13, %14 : vector<8x512xf32>
    %16 = arith.truncf %15 : vector<8x512xf32> to vector<8x512xbf16>
    %c0_8 = arith.constant 0 : index
    %c0_9 = arith.constant 0 : index
    %17 = vector.load %arg5[%c0_8, %c0_9] : memref<512x384xbf16, #tpu.memory_space<vmem>>, vector<512x384xbf16>
    %cst_10 = arith.constant dense<0.000000e+00> : vector<8x384xf32>
    %18 = tpu.matmul %16, %17, %cst_10 {dimension_numbers = #tpu.dot_dimension_numbers<[1], [0], [0], [1], [0, 0, 1, 1], [], []>} : vector<8x512xbf16>, vector<512x384xbf16>, vector<8x384xf32> -> vector<8x384xf32>
    %c0_11 = arith.constant 0 : index
    %c0_12 = arith.constant 0 : index
    %19 = vector.load %arg6[%c0_11, %c0_12] : memref<1x384xf32, #tpu.memory_space<vmem>>, vector<1x384xf32>
    %20 = vector.broadcast %19 : vector<1x384xf32> to vector<8x384xf32>
    %21 = arith.addf %18, %20 : vector<8x384xf32>
    %cst_13 = arith.constant 0.000000e+00 : f32
    %22 = vector.broadcast %cst_13 : f32 to vector<8x384xf32>
    %23 = arith.maximumf %21, %22 : vector<8x384xf32>
    %c0_14 = arith.constant 0 : index
    %c0_15 = arith.constant 0 : index
    %24 = vector.load %arg7[%c0_14, %c0_15] : memref<1x384xf32, #tpu.memory_space<vmem>>, vector<1x384xf32>
    %25 = vector.broadcast %24 : vector<1x384xf32> to vector<8x384xf32>
    %26 = arith.mulf %23, %25 : vector<8x384xf32>
    %cst_16 = arith.constant dense<0.000000e+00> : vector<8xf32>
    %27 = vector.multi_reduction <add>, %26, %cst_16 [1] : vector<8x384xf32> to vector<8xf32>
    %28 = vector.shape_cast %27 : vector<8xf32> to vector<8x1xf32>
    %c0_17 = arith.constant 0 : index
    %c0_18 = arith.constant 0 : index
    %29 = vector.load %arg8[%c0_17, %c0_18] : memref<1x1xf32, #tpu.memory_space<vmem>>, vector<1x1xf32>
    %30 = vector.broadcast %29 : vector<1x1xf32> to vector<8x1xf32>
    %31 = arith.addf %28, %30 : vector<8x1xf32>
    %cst_19 = arith.constant 0.000000e+00 : f32
    %cst_20 = arith.constant 1.000000e+00 : f32
    %32 = vector.broadcast %cst_19 : f32 to vector<8x1xf32>
    %33 = arith.maximumf %32, %31 : vector<8x1xf32>
    %34 = vector.broadcast %cst_20 : f32 to vector<8x1xf32>
    %35 = arith.minimumf %34, %33 : vector<8x1xf32>
    %c0_21 = arith.constant 0 : index
    %c0_22 = arith.constant 0 : index
    %36 = vector.load %arg9[%c0_21, %c0_22] : memref<8x1xf32, #tpu.memory_space<vmem>>, vector<8x1xf32>
    tpu.vector_store %arg9[%c0_21, %c0_22], %35 {strides = array<i32>} : memref<8x1xf32, #tpu.memory_space<vmem>>, vector<8x1xf32>,
    return
  }
  func.func @transform_0(%arg0: i32) -> (i32, i32) {
    %c0_i32 = arith.constant 0 : i32
    %c0_i32_0 = arith.constant 0 : i32
    return %arg0, %c0_i32 : i32, i32
  }
  func.func @transform_1(%arg0: i32) -> (i32, i32) {
    %c0_i32 = arith.constant 0 : i32
    %c0_i32_0 = arith.constant 0 : i32
    %c0_i32_1 = arith.constant 0 : i32
    return %c0_i32, %c0_i32_0 : i32, i32
  }
  func.func @transform_2(%arg0: i32) -> (i32, i32) {
    %c0_i32 = arith.constant 0 : i32
    %c0_i32_0 = arith.constant 0 : i32
    %c0_i32_1 = arith.constant 0 : i32
    return %c0_i32, %c0_i32_0 : i32, i32
  }
  func.func @transform_3(%arg0: i32) -> (i32, i32) {
    %c0_i32 = arith.constant 0 : i32
    %c0_i32_0 = arith.constant 0 : i32
    %c0_i32_1 = arith.constant 0 : i32
    return %c0_i32, %c0_i32_0 : i32, i32
  }
  func.func @transform_4(%arg0: i32) -> (i32, i32) {
    %c0_i32 = arith.constant 0 : i32
    %c0_i32_0 = arith.constant 0 : i32
    %c0_i32_1 = arith.constant 0 : i32
    return %c0_i32, %c0_i32_0 : i32, i32
  }
  func.func @transform_5(%arg0: i32) -> (i32, i32) {
    %c0_i32 = arith.constant 0 : i32
    %c0_i32_0 = arith.constant 0 : i32
    %c0_i32_1 = arith.constant 0 : i32
    return %c0_i32, %c0_i32_0 : i32, i32
  }
  func.func @transform_6(%arg0: i32) -> (i32, i32) {
    %c0_i32 = arith.constant 0 : i32
    %c0_i32_0 = arith.constant 0 : i32
    %c0_i32_1 = arith.constant 0 : i32
    return %c0_i32, %c0_i32_0 : i32, i32
  }
  func.func @transform_7(%arg0: i32) -> (i32, i32) {
    %c0_i32 = arith.constant 0 : i32
    %c0_i32_0 = arith.constant 0 : i32
    %c0_i32_1 = arith.constant 0 : i32
    return %c0_i32, %c0_i32_0 : i32, i32
  }
  func.func @transform_8(%arg0: i32) -> (i32, i32) {
    %c0_i32 = arith.constant 0 : i32
    %c0_i32_0 = arith.constant 0 : i32
    return %arg0, %c0_i32 : i32, i32
  }
}

</mosaic_0001>

<bundles_post_ra>
// kernel: tpu_custom_call.1
= control target key start
LH: loop header
LB: loop body
LE: loop exit
PB: predicated region body
PF: predicated region fallthrough
CT: control target
= control target key end

     0   :  { %s1820_s0 = inlined_call_operand.vmem [shape: f32[16,2], index: 0, kind: input, shape index: {}]   ;;  %s1821_s1 = inlined_call_operand.vmem [shape: f32[1,512], index: 1, kind: input, shape index: {}]   ;;  %s1822_s2 = inlined_call_operand.vmem [shape: f32[1,512], index: 2, kind: input, shape index: {}]   ;;  %s1823_s3 = inlined_call_operand.vmem [shape: f32[1,512], index: 3, kind: input, shape index: {}]   ;;  %s1824_s4 = inlined_call_operand.hbm [shape: bf16[512,384], index: 4, kind: input, shape index: {}]   ;;  %s1825_s5 = inlined_call_operand.vmem [shape: f32[1,384], index: 5, kind: input, shape index: {}]   ;;  %s1826_s6 = inlined_call_operand.vmem [shape: f32[1,384], index: 6, kind: input, shape index: {}]   ;;  %s1827_s7 = inlined_call_operand.<no memory space> [shape: f32[1,1], index: 7, kind: input, shape index: {}]   ;;  %s1828_s8 = inlined_call_operand.vmem [shape: f32[16,1], index: 8, kind: output, shape index: {}]  }
   0x1   :  { %v13_v0 = vstv %s1827_s7 }
   0x2   :  { %14 = vst [vmem:[#allocation2] sm:$0x1] %v13_v0 }
   0x3   :  { %15 = vsyncpa [#allocation4], 0  ;;  %s1738_s29 = smov 0  }
   0x4 LB: > { %s1342_s30 = sadd.s32 4294967295, %s1683_s29   ;;  %p1344_p0 = scmp.ge.s32.totalorder %s1683_s29, 1  ;;  %s1683_s29 = sphi %s1738_s29, %s21_s29  }
   0x5   : > { %p225_p1 = scmp.lt.s32.totalorder %s1683_s29, 3  ;;  %s1685_s9 = smov [#allocation3]  }
   0x6   : > { %s246_s10 = sshll.u32 %s1685_s9, 4  ;;  %p1502_p3 = scmp.eq.s32.totalorder %s1342_s30, 0  ;;  %s247_s10 = int_to_ptr.vmem [resolvable:$true] %s246_s10 }
   0x7   : > { %p1746_p2 = pnand %p1344_p0, %p225_p1  ;;  %s1658_s7 = scalar_lea.vmem %s247_s10, 12288 }
   0x8   : > { %p1659_p7 = scmp.ne.s32.totalorder %s247_s10, %s1658_s7  ;;  %p1666_p10 = scmp.lt.s32.totalorder %s247_s10, %s247_s10 }
   0x9   : > { %p1498_p4 = pneg %p1746_p2  ;;  %p1667_p11 = scmp.lt.s32.totalorder %s1658_s7, %s1658_s7 }
   0xb   : > { %p1499_p5 = pnand %p1502_p3, %p1498_p4  ;;  %p1668_p12 = por %p1667_p11, %p1666_p10 }
   0xd   : > { %p1649_p6 = pneg %p1499_p5 }
   0xf   : > { %p1661_p8 = pnand %p1659_p7, %p1649_p6 }
  0x11   : > { %p1662_p9 = pneg %p1661_p8 }
  0x13   : > { %p1669_p13 = pnand %p1668_p12, %p1662_p9 }
  0x15   : > { %1672 = shalt.err (!%p1669_p13)
}
  0x16   : > { %s1686_s12 = smov 192   ;;  %s1687_s13 = smov 12  }
  0x17   : > { %1501 = dma.hbm_to_vmem [thread:$0]  (!%p1499_p5), %s1824_s4, 12288, %s247_s10, [#allocation4], %s1686_s12, %s1686_s12, %s1687_s13  }
  0x18   : > { %278 = sbr.rel (%p1746_p2) target bundleno = 560 (0x230), region = 52 }
  0x1d   : > { %1678 = dma.done.wait (%p1502_p3), [#allocation4], 12288  }
  0x1e   : > { %1680 = vsyncadd (%p1502_p3), [#allocation4], 4294955008  ;;  %p310_p0 = scmp.lt.s32.totalorder %s1342_s30, 1  ;;  %v1688_v1 = vmov 0   ;;  %v1519_v3 = vld [vmem:[#allocation3 + $0xac] ss:$12 sps:$4 sm:$0xff]  }
  0x1f   : > { %1517 = vset.pattern.permute.xlu0 %v1688_v1  ;;  %v1521_v4 = vld [vmem:[#allocation3 + $0x22c] ss:$12 sps:$4 sm:$0xff]   ;;  %v1523_v5 = vld [vmem:[#allocation3 + $0xa8] ss:$12 sps:$4 sm:$0xff]   ;;  %1076 = vmatprep.subr.bf16.mxu0 %v1519_v3  ;;  %v1689_v9 = vmov 1   ;;  %vm1275_vm0 = vcmask 7168  }
  0x20   : > { %s1831_s30 = smov (!%p310_p0, %s1342_s30), 1  ;;  %v1524_v6 = vld [vmem:[#allocation3 + $0x228] ss:$12 sps:$4 sm:$0xff]   ;;  %1117 = vmatprep.subr.bf16.mxu1 %v1521_v4  ;;  %1077 = vmatpush1.bf16.msra.mxu0 %v1523_v5  ;;  %v1529_v10 = vld [vmem:[#allocation3 + $0x90] ss:$12 sps:$4 sm:$0xff]  }
  0x21   : > { %s1349_s16 = sshll.u32 %s1831_s30, 3  ;;  %v1525_v7 = vld [vmem:[#allocation3 + $0x94] ss:$12 sps:$4 sm:$0xff]   ;;  %1118 = vmatpush1.bf16.msra.mxu1 %v1524_v6  ;;  %v1530_v11 = vld [vmem:[#allocation3 + $0x210] ss:$12 sps:$4 sm:$0xff]   ;;  %v327_v6 = vlaneseq }
  0x22   : > { %s313_s19 = scalar_lea.vmem %s1820_s0, %s1349_s16  ;;  %v1527_v8 = vld [vmem:[#allocation3 + $0x214] ss:$12 sps:$4 sm:$0xff]   ;;  %1078 = vmatprep.subr.bf16.mxu0 %v1525_v7  ;;  %v1531_v12 = vld [vmem:[#allocation3 + $0x7c] ss:$12 sps:$4 sm:$0xff]   ;;  %v1535_v14 = vld [vmem:[#allocation3 + $0x78] ss:$12 sps:$4 sm:$0xff]   ;;  %s317_s7 = scalar_lea.vmem %s1828_s8, %s1349_s16 }
  0x23   : > { %v319_v2 = vld [vmem:[%s313_s19] sm:$0xff]  ;;  %1119 = vmatprep.subr.bf16.mxu1 %v1527_v8  ;;  %v1543_v20 = vld [vmem:[#allocation3 + $0x4c] ss:$12 sps:$4 sm:$0xff]   ;;  %v1547_v22 = vld [vmem:[#allocation3 + $0x48] ss:$12 sps:$4 sm:$0xff]   ;;  %v328_v7 = vshrl.u32 %v327_v6, 7 }
  0x24   : > { %323 = vperm.xlu0 %1517, %v319_v2   ;;  %v1533_v13 = vld [vmem:[#allocation3 + $0x1fc] ss:$12 sps:$4 sm:$0xff]   ;;  %1079 = vmatpush1.bf16.msra.mxu0 %v1529_v10  ;;  %v1536_v15 = vld [vmem:[#allocation3 + $0x1f8] ss:$12 sps:$4 sm:$0xff]   ;;  %v1541_v18 = vld [vmem:[#allocation3 + $0x60] ss:$12 sps:$4 sm:$0xff]  }
  0x25   : > { %1120 = vmatpush1.bf16.msra.mxu1 %v1530_v11  ;;  %1080 = vmatprep.subr.bf16.mxu0 %v1531_v12  ;;  %v1537_v16 = vld [vmem:[#allocation3 + $0x64] ss:$12 sps:$4 sm:$0xff]   ;;  %v1542_v19 = vld [vmem:[#allocation3 + $0x1e0] ss:$12 sps:$4 sm:$0xff]   ;;  %v1548_v23 = vld [vmem:[#allocation3 + $0x1c8] ss:$12 sps:$4 sm:$0xff]  }
  0x26   : > { %1121 = vmatprep.subr.bf16.mxu1 %v1533_v13  ;;  %v1539_v17 = vld [vmem:[#allocation3 + $0x1e4] ss:$12 sps:$4 sm:$0xff]   ;;  %v1545_v21 = vld [vmem:[#allocation3 + $0x1cc] ss:$12 sps:$4 sm:$0xff]   ;;  %v1549_v24 = vld [vmem:[#allocation3 + $0x34] ss:$12 sps:$4 sm:$0xff]  }
  0x27   : > { %v1551_v25 = vld [vmem:[#allocation3 + $0x1b4] ss:$12 sps:$4 sm:$0xff]   ;;  %v1553_v26 = vld [vmem:[#allocation3 + $0x30] ss:$12 sps:$4 sm:$0xff]   ;;  %v1559_v30 = vld [vmem:[#allocation3 + $0x18] ss:$12 sps:$4 sm:$0xff]  }
  0x28   : > { %1518 = vset.pattern.permute.xlu0 %v1689_v9  ;;  %1081 = vmatpush1.bf16.msra.mxu0 %v1535_v14  ;;  %v1554_v27 = vld [vmem:[#allocation3 + $0x1b0] ss:$12 sps:$4 sm:$0xff]   ;;  %v1560_v31 = vld [vmem:[#allocation3 + $0x198] ss:$12 sps:$4 sm:$0xff]   ;;  %v1565_v34 = vld [vmem:[#allocation3] ss:$12 sps:$4 sm:$0xff]  }
  0x29   : > { %353 = vperm.xlu0 %1518, %v319_v2   ;;  %1122 = vmatpush1.bf16.msra.mxu1 %v1536_v15  ;;  %v1555_v28 = vld [vmem:[#allocation3 + $0x1c] ss:$12 sps:$4 sm:$0xff]   ;;  %v1561_v32 = vld [vmem:[#allocation3 + $0x4] ss:$12 sps:$4 sm:$0xff]   ;;  %v1566_v35 = vld [vmem:[#allocation3 + $0x180] ss:$12 sps:$4 sm:$0xff]  }
  0x2a   : > { %1082 = vmatprep.subr.bf16.mxu0 %v1537_v16  ;;  %1123 = vmatprep.subr.bf16.mxu1 %v1539_v17  ;;  %v1557_v29 = vld [vmem:[#allocation3 + $0x19c] ss:$12 sps:$4 sm:$0xff]   ;;  %v1563_v33 = vld [vmem:[#allocation3 + $0x184] ss:$12 sps:$4 sm:$0xff]   ;;  %v1567_v36 = vld [vmem:[#allocation3 + $0x16c] ss:$12 sps:$4 sm:$0xff]  }
  0x2b   : > { %v1569_v37 = vld [vmem:[#allocation3 + $0x2ec] ss:$12 sps:$4 sm:$0xff]   ;;  %v1571_v38 = vld [vmem:[#allocation3 + $0x168] ss:$12 sps:$4 sm:$0xff]   ;;  %v1577_v42 = vld [vmem:[#allocation3 + $0x150] ss:$12 sps:$4 sm:$0xff]  }
  0x2c   : > { %1083 = vmatpush1.bf16.msra.mxu0 %v1541_v18  ;;  %v1572_v39 = vld [vmem:[#allocation3 + $0x2e8] ss:$12 sps:$4 sm:$0xff]   ;;  %v1578_v43 = vld [vmem:[#allocation3 + $0x2d0] ss:$12 sps:$4 sm:$0xff]   ;;  %v1583_v46 = vld [vmem:[#allocation3 + $0x138] ss:$12 sps:$4 sm:$0xff]  }
  0x2d   : > { %1124 = vmatpush1.bf16.msra.mxu1 %v1542_v19  ;;  %1084 = vmatprep.subr.bf16.mxu0 %v1543_v20  ;;  %v1573_v40 = vld [vmem:[#allocation3 + $0x154] ss:$12 sps:$4 sm:$0xff]   ;;  %v1579_v44 = vld [vmem:[#allocation3 + $0x13c] ss:$12 sps:$4 sm:$0xff]   ;;  %v1584_v47 = vld [vmem:[#allocation3 + $0x2b8] ss:$12 sps:$4 sm:$0xff]  }
  0x2e   : > { %1125 = vmatprep.subr.bf16.mxu1 %v1545_v21  ;;  %v1575_v41 = vld [vmem:[#allocation3 + $0x2d4] ss:$12 sps:$4 sm:$0xff]   ;;  %v1581_v45 = vld [vmem:[#allocation3 + $0x2bc] ss:$12 sps:$4 sm:$0xff]   ;;  %v1585_v48 = vld [vmem:[#allocation3 + $0x124] ss:$12 sps:$4 sm:$0xff]  }
  0x2f   : > { %v1587_v49 = vld [vmem:[#allocation3 + $0x2a4] ss:$12 sps:$4 sm:$0xff]   ;;  %v1589_v50 = vld [vmem:[#allocation3 + $0x120] ss:$12 sps:$4 sm:$0xff]   ;;  %v1595_v54 = vld [vmem:[#allocation3 + $0x108] ss:$12 sps:$4 sm:$0xff]  }
  0x30   : > { %1085 = vmatpush1.bf16.msra.mxu0 %v1547_v22  ;;  %v1590_v51 = vld [vmem:[#allocation3 + $0x2a0] ss:$12 sps:$4 sm:$0xff]   ;;  %v1596_v55 = vld [vmem:[#allocation3 + $0x288] ss:$12 sps:$4 sm:$0xff]   ;;  %v1601_v58 = vld [vmem:[#allocation3 + $0xf0] ss:$12 sps:$4 sm:$0xff]  }
  0x31   : > { %1126 = vmatpush1.bf16.msra.mxu1 %v1548_v23  ;;  %1086 = vmatprep.subr.bf16.mxu0 %v1549_v24  ;;  %v1591_v52 = vld [vmem:[#allocation3 + $0x10c] ss:$12 sps:$4 sm:$0xff]   ;;  %v1597_v56 = vld [vmem:[#allocation3 + $0xf4] ss:$12 sps:$4 sm:$0xff]   ;;  %v1602_v59 = vld [vmem:[#allocation3 + $0x270] ss:$12 sps:$4 sm:$0xff]  }
  0x32   : > { %1127 = vmatprep.subr.bf16.mxu1 %v1551_v25  ;;  %v1593_v53 = vld [vmem:[#allocation3 + $0x28c] ss:$12 sps:$4 sm:$0xff]   ;;  %v1599_v57 = vld [vmem:[#allocation3 + $0x274] ss:$12 sps:$4 sm:$0xff]   ;;  %v1603_v60 = vld [vmem:[#allocation3 + $0xdc] ss:$12 sps:$4 sm:$0xff]  }
  0x33   : > { %v1605_v61 = vld [vmem:[#allocation3 + $0x25c] ss:$12 sps:$4 sm:$0xff]   ;;  %v1607_v62 = vld [vmem:[#allocation3 + $0xd8] ss:$12 sps:$4 sm:$0xff]   ;;  %v1613_v2 = vld [vmem:[#allocation3 + $0xc0] ss:$12 sps:$4 sm:$0xff]  }
  0x34   : > { %1087 = vmatpush1.bf16.msra.mxu0 %v1553_v26  ;;  %v1608_v63 = vld [vmem:[#allocation3 + $0x258] ss:$12 sps:$4 sm:$0xff]   ;;  %v1614_v3 = vld [vmem:[#allocation3 + $0x240] ss:$12 sps:$4 sm:$0xff]   ;;  %v1615_v4 = vld [vmem:[#allocation3 + $0x170] ss:$12 sps:$4 sm:$0xff]  }
  0x35   : > { %1128 = vmatpush1.bf16.msra.mxu1 %v1554_v27  ;;  %1088 = vmatprep.subr.bf16.mxu0 %v1555_v28  ;;  %v1609_v0 = vld [vmem:[#allocation3 + $0xc4] ss:$12 sps:$4 sm:$0xff]   ;;  %v1768_v8 = vsub.s32 0, %v328_v7  ;;  %v1770_v9 = vsub.s32 1, %v328_v7  ;;  %v1772_v10 = vsub.s32 2, %v328_v7  ;;  %v341_v11 = vsub.s32 3, %v328_v7 }
  0x36   : > { %1129 = vmatprep.subr.bf16.mxu1 %v1557_v29  ;;  %v1611_v1 = vld [vmem:[#allocation3 + $0x244] ss:$12 sps:$4 sm:$0xff]   ;;  %v320_v12 = vld [vmem:[%s1821_s1] sm:$0xf] }
  0x37   : > { %v1616_v5 = vld [vmem:[#allocation3 + $0x2f0] ss:$12 sps:$4 sm:$0xff]   ;;  %v330_v15 = vrot.slane %v320_v12, %v1768_v8  ;;  %v334_v16 = vrot.slane %v320_v12, %v1770_v9  ;;  %v338_v17 = vrot.slane %v320_v12, %v1772_v10  ;;  %v342_v18 = vrot.slane %v320_v12, %v341_v11  ;;  %v1635_v7 = vld [vmem:[#allocation3 + $0xf8] ss:$12 sps:$4 sm:$0xff]  }
  0x38   : > { %1089 = vmatpush1.bf16.msra.mxu0 %v1559_v30  ;;  %v351_v13 = vld [vmem:[%s1822_s2] sm:$0xf]  ;;  %v1637_v12 = vld [vmem:[#allocation3 + $0x38] ss:$12 sps:$4 sm:$0xff]  }
  0x39   : > { %1130 = vmatpush1.bf16.msra.mxu1 %v1560_v31  ;;  %1090 = vmatprep.subr.bf16.mxu0 %v1561_v32  ;;  %v385_v19 = vld [vmem:[%s1823_s3] sm:$0xf]  ;;  %v360_v20 = vrot.slane %v351_v13, %v1768_v8  ;;  %v364_v21 = vrot.slane %v351_v13, %v1770_v9  ;;  %v368_v22 = vrot.slane %v351_v13, %v1772_v10 }
  0x3a   : > { %1131 = vmatprep.subr.bf16.mxu1 %v1563_v33  ;;  %v372_v23 = vrot.slane %v351_v13, %v341_v11  ;;  %v394_v24 = vrot.slane %v385_v19, %v1770_v9  ;;  %v402_v25 = vrot.slane %v385_v19, %v341_v11  ;;  %v390_v26 = vrot.slane %v385_v19, %v1768_v8  ;;  %v1634_v6 = vld [vmem:[#allocation3 + $0x1d0] ss:$12 sps:$4 sm:$0xff]   ;;  %v1636_v11 = vld [vmem:[#allocation3 + $0x278] ss:$12 sps:$4 sm:$0xff]  }
  0x3b   : > { %v398_v27 = vrot.slane %v385_v19, %v1772_v10  ;;  %v1638_v13 = vld [vmem:[#allocation3 + $0x1b8] ss:$12 sps:$4 sm:$0xff]   ;;  %v1644_v19 = vld [vmem:[#allocation3 + $0x248] ss:$12 sps:$4 sm:$0xff]  }
  0x3c   : > { %1091 = vmatpush1.bf16.msra.mxu0 %v1565_v34 }
  0x3d   : > { %1132 = vmatpush1.bf16.msra.mxu1 %v1566_v35  ;;  %1092 = vmatprep.subr.bf16.mxu0 %v1567_v36 }
  0x3e   : > { %1133 = vmatprep.subr.bf16.mxu1 %v1569_v37 }
  0x40   : > { %1093 = vmatpush2.bf16.msra.mxu0 %v1571_v38 }
  0x41   : > { %1134 = vmatpush2.bf16.msra.mxu1 %v1572_v39  ;;  %1094 = vmatprep.subr.bf16.mxu0 %v1573_v40 }
  0x42   : > { %1135 = vmatprep.subr.bf16.mxu1 %v1575_v41 }
  0x44   : > { %1095 = vmatpush2.bf16.msra.mxu0 %v1577_v42 }
  0x45   : > { %1136 = vmatpush2.bf16.msra.mxu1 %v1578_v43  ;;  %1096 = vmatprep.subr.bf16.mxu0 %v1579_v44 }
  0x46   : > { %1137 = vmatprep.subr.bf16.mxu1 %v1581_v45 }
  0x48   : > { %1097 = vmatpush2.bf16.msra.mxu0 %v1583_v46 }
  0x49   : > { %1138 = vmatpush2.bf16.msra.mxu1 %v1584_v47  ;;  %1098 = vmatprep.subr.bf16.mxu0 %v1585_v48 }
  0x4a   : > { %1139 = vmatprep.subr.bf16.mxu1 %v1587_v49 }
  0x4c   : > { %1099 = vmatpush2.bf16.msra.mxu0 %v1589_v50 }
  0x4d   : > { %1140 = vmatpush2.bf16.msra.mxu1 %v1590_v51  ;;  %1100 = vmatprep.subr.bf16.mxu0 %v1591_v52 }
  0x4e   : > { %1141 = vmatprep.subr.bf16.mxu1 %v1593_v53  ;;  %v1617_v53 = vld [vmem:[#allocation3 + $0xb0] ss:$12 sps:$4 sm:$0xff]  }
  0x50   : > { %1101 = vmatpush2.bf16.msra.mxu0 %v1595_v54  ;;  %v1618_v54 = vld [vmem:[#allocation3 + $0x230] ss:$12 sps:$4 sm:$0xff]  }
  0x51   : > { %1142 = vmatpush2.bf16.msra.mxu1 %v1596_v55  ;;  %1102 = vmatprep.subr.bf16.mxu0 %v1597_v56  ;;  %v1619_v55 = vld [vmem:[#allocation3 + $0x158] ss:$12 sps:$4 sm:$0xff]  }
  0x52   : > { %1143 = vmatprep.subr.bf16.mxu1 %v1599_v57  ;;  %v1620_v56 = vld [vmem:[#allocation3 + $0x2d8] ss:$12 sps:$4 sm:$0xff]  }
  0x53   : > { %v1621_v57 = vld [vmem:[#allocation3 + $0x98] ss:$12 sps:$4 sm:$0xff]  }
  0x54   : > { %1103 = vmatpush2.bf16.msra.mxu0 %v1601_v58  ;;  %v1622_v58 = vld [vmem:[#allocation3 + $0x218] ss:$12 sps:$4 sm:$0xff]  }
  0x55   : > { %1144 = vmatpush2.bf16.msra.mxu1 %v1602_v59  ;;  %1104 = vmatprep.subr.bf16.mxu0 %v1603_v60  ;;  %v1623_v59 = vld [vmem:[#allocation3 + $0x140] ss:$12 sps:$4 sm:$0xff]  }
  0x56   : > { %1145 = vmatprep.subr.bf16.mxu1 %v1605_v61  ;;  %v1624_v60 = vld [vmem:[#allocation3 + $0x2c0] ss:$12 sps:$4 sm:$0xff]  }
  0x57   : > { %v1625_v61 = vld [vmem:[#allocation3 + $0x80] ss:$12 sps:$4 sm:$0xff]  }
  0x58   : > { %1105 = vmatpush2.bf16.msra.mxu0 %v1607_v62  ;;  %v1626_v62 = vld [vmem:[#allocation3 + $0x200] ss:$12 sps:$4 sm:$0xff]  }
  0x59   : > { %1146 = vmatpush2.bf16.msra.mxu1 %v1608_v63  ;;  %1106 = vmatprep.subr.bf16.mxu0 %v1609_v0  ;;  %v1627_v63 = vld [vmem:[#allocation3 + $0x128] ss:$12 sps:$4 sm:$0xff]  }
  0x5a   : > { %1147 = vmatprep.subr.bf16.mxu1 %v1611_v1  ;;  %v1628_v0 = vld [vmem:[#allocation3 + $0x2a8] ss:$12 sps:$4 sm:$0xff]  }
  0x5b   : > { %v1629_v1 = vld [vmem:[#allocation3 + $0x68] ss:$12 sps:$4 sm:$0xff]  }
  0x5c   : > { %1107 = vmatpush2.bf16.msra.mxu0 %v1613_v2  ;;  %v1630_v2 = vld [vmem:[#allocation3 + $0x1e8] ss:$12 sps:$4 sm:$0xff]  }
  0x5d   : > { %1148 = vmatpush2.bf16.msra.mxu1 %v1614_v3  ;;  %1450 = vmatprep.subr.bf16.mxu0 %v1615_v4  ;;  %v1631_v3 = vld [vmem:[#allocation3 + $0x110] ss:$12 sps:$4 sm:$0xff]  }
  0x5e   : > { %1472 = vmatprep.subr.bf16.mxu1 %v1616_v5  ;;  %v1632_v4 = vld [vmem:[#allocation3 + $0x290] ss:$12 sps:$4 sm:$0xff]  }
  0x5f   : > { %v1633_v5 = vld [vmem:[#allocation3 + $0x50] ss:$12 sps:$4 sm:$0xff]  }
  0x9f   : > { %v324_v14 = vpop.permute.xlu0 %323 }
  0xa0   : > { %v347_v28 = vmul.f32 %v330_v15, %v324_v14  ;;  %v348_v29 = vmul.f32 %v334_v16, %v324_v14  ;;  %v349_v30 = vmul.f32 %v338_v17, %v324_v14  ;;  %v350_v31 = vmul.f32 %v342_v18, %v324_v14  ;;  %v1639_v14 = vld [vmem:[#allocation3 + $0xe0] ss:$12 sps:$4 sm:$0xff]   ;;  %v1643_v18 = vld [vmem:[#allocation3 + $0xc8] ss:$12 sps:$4 sm:$0xff]  }
  0xa1   : > { %v1640_v15 = vld [vmem:[#allocation3 + $0x260] ss:$12 sps:$4 sm:$0xff]  }
  0xa2   : > { %v1641_v16 = vld [vmem:[#allocation3 + $0x20] ss:$12 sps:$4 sm:$0xff]  }
  0xa3   : > { %v1642_v17 = vld [vmem:[#allocation3 + $0x1a0] ss:$12 sps:$4 sm:$0xff]  }
  0xa4   : > { %v354_v32 = vpop.permute.xlu0 %353 }
  0xa5   : > { %v377_v33 = vmul.f32 %v360_v20, %v354_v32  ;;  %v378_v34 = vmul.f32 %v364_v21, %v354_v32  ;;  %v379_v35 = vmul.f32 %v368_v22, %v354_v32  ;;  %v380_v36 = vmul.f32 %v372_v23, %v354_v32  ;;  %v1645_v20 = vld [vmem:[#allocation3 + $0x8] ss:$12 sps:$4 sm:$0xff]  }
  0xa6   : > { %v1646_v21 = vld [vmem:[#allocation3 + $0x188] ss:$12 sps:$4 sm:$0xff]  }
  0xa7   : > { %v381_v37 = vadd.f32 %v377_v33, %v347_v28  ;;  %v383_v38 = vadd.f32 %v379_v35, %v349_v30  ;;  %v382_v39 = vadd.f32 %v378_v34, %v348_v29  ;;  %v384_v40 = vadd.f32 %v380_v36, %v350_v31  ;;  %v547_v30 = vld [vmem:[%s1825_s5] sm:$0x7] }
  0xa8   : > { %v556_v31 = vrot.slane %v547_v30, %v1770_v9  ;;  %v552_v32 = vrot.slane %v547_v30, %v1768_v8 }
  0xa9   : > { %v408_v41 = vadd.f32 %v394_v24, %v382_v39  ;;  %v410_v42 = vadd.f32 %v402_v25, %v384_v40  ;;  %v407_v43 = vadd.f32 %v390_v26, %v381_v37  ;;  %v409_v44 = vadd.f32 %v398_v27, %v383_v38  ;;  %v1241_v40 = vld [vmem:[%s1826_s6] sm:$0x7] }
  0xaa   : > { %v560_v39 = vrot.slane %v547_v30, %v1772_v10 }
  0xab   : > { %v412_v45 = vmax.f32 %v408_v41, 0.0  ;;  %v414_v46 = vmax.f32 %v410_v42, 0.0  ;;  %v411_v47 = vmax.f32 %v407_v43, 0.0  ;;  %v413_v48 = vmax.f32 %v409_v44, 0.0 }
  0xac   : > { %v1250_v44 = vrot.slane %v1241_v40, %v1770_v9 }
  0xad   : > { %v416_v49 = vpack.c.bf16 %v412_v45, %v412_v45  ;;  %v418_v50 = vpack.c.bf16 %v414_v46, %v414_v46  ;;  %v1792_v51 = vpack.c.bf16 %v411_v47, %v411_v47  ;;  %v1794_v52 = vpack.c.bf16 %v413_v48, %v413_v48 }
  0xaf   : > { %1108 = vmatprep.mubr.bf16.mxu0 %v416_v49  ;;  %1149 = vmatprep.mubr.bf16.mxu1 %v418_v50 }
  0xb0   : > { %1109 = vmatmul.mubr.bf16.vlgmr.msra.gmra.mxu0 %v1792_v51  ;;  %1150 = vmatmul.mubr.bf16.vlgmr.msra.gmra.mxu1 %v1794_v52 }
  0xb1   : > { %1451 = vmatpush3.bf16.msra.mxu0 %v1617_v53  ;;  %1473 = vmatpush3.bf16.msra.mxu1 %v1618_v54 }
  0xb2   : > { %1190 = vmatprep.mubr.bf16.mxu0 %v416_v49  ;;  %1230 = vmatprep.mubr.bf16.mxu1 %v418_v50  ;;  %v1246_v49 = vrot.slane %v1241_v40, %v1768_v8 }
  0xb3   : > { %1452 = vmatprep.subr.bf16.mxu0 %v1619_v55  ;;  %1474 = vmatprep.subr.bf16.mxu1 %v1620_v56  ;;  %v1254_v56 = vrot.slane %v1241_v40, %v1772_v10 }
  0xb5   : > { %1453 = vmatpush3.bf16.msra.mxu0 %v1621_v57  ;;  %1475 = vmatpush3.bf16.msra.mxu1 %v1622_v58 }
  0xb6   : > { %1454 = vmatprep.subr.bf16.mxu0 %v1623_v59  ;;  %1476 = vmatprep.subr.bf16.mxu1 %v1624_v60 }
  0xb9   : > { %1455 = vmatpush3.bf16.msra.mxu0 %v1625_v61  ;;  %1477 = vmatpush3.bf16.msra.mxu1 %v1626_v62  ;;  %v1447_v61 = vld [vmem:[#allocation2] ss:$0 sm:$0xff] }
  0xba   : > { %1456 = vmatprep.subr.bf16.mxu0 %v1627_v63  ;;  %1478 = vmatprep.subr.bf16.mxu1 %v1628_v0 }
  0xbd   : > { %1457 = vmatpush3.bf16.msra.mxu0 %v1629_v1  ;;  %1479 = vmatpush3.bf16.msra.mxu1 %v1630_v2 }
  0xbe   : > { %1458 = vmatprep.subr.bf16.mxu0 %v1631_v3  ;;  %1480 = vmatprep.subr.bf16.mxu1 %v1632_v4 }
  0xc1   : > { %1459 = vmatpush3.bf16.msra.mxu0 %v1633_v5  ;;  %1481 = vmatpush3.bf16.msra.mxu1 %v1634_v6 }
  0xc2   : > { %1460 = vmatprep.subr.bf16.mxu0 %v1635_v7  ;;  %1482 = vmatprep.subr.bf16.mxu1 %v1636_v11 }
  0xc5   : > { %1461 = vmatpush3.bf16.msra.mxu0 %v1637_v12  ;;  %1483 = vmatpush3.bf16.msra.mxu1 %v1638_v13 }
  0xc6   : > { %1462 = vmatprep.subr.bf16.mxu0 %v1639_v14  ;;  %1484 = vmatprep.subr.bf16.mxu1 %v1640_v15 }
  0xc9   : > { %1463 = vmatpush3.bf16.msra.mxu0 %v1641_v16  ;;  %1485 = vmatpush3.bf16.msra.mxu1 %v1642_v17 }
  0xca   : > { %1464 = vmatprep.subr.bf16.mxu0 %v1643_v18  ;;  %1486 = vmatprep.subr.bf16.mxu1 %v1644_v19 }
  0xcd   : > { %1465 = vmatpush3.bf16.msra.mxu0 %v1645_v20  ;;  %1487 = vmatpush3.bf16.msra.mxu1 %v1646_v21 }
  0xd0   : > { %1191 = vmatmul.mubr.bf16.vlgmr.msra.gmra.mxu0 %v1792_v51  ;;  %1231 = vmatmul.mubr.bf16.vlgmr.msra.gmra.mxu1 %v1794_v52 }
 0x170   : > { %v1110_v22 = vpop.f32.mrf.mxu0  ;;  %v1151_v23 = vpop.f32.mrf.mxu1 }
 0x171   : > { %v1111_v34 = vadd.f32 %v1110_v22, %v552_v32 }
 0x172   : > { %v1112_v24 = vpop.f32.mrf.mxu0  ;;  %v1153_v25 = vpop.f32.mrf.mxu1 }
 0x173   : > { %v1113_v33 = vadd.f32 %v1112_v24, %v556_v31  ;;  %v1152_v38 = vadd.f32 %v1151_v23, %v1111_v34 }
 0x174   : > { %v1114_v26 = vpop.f32.mrf.mxu0  ;;  %v1155_v27 = vpop.f32.mrf.mxu1 }
 0x175   : > { %v1154_v35 = vadd.f32 %v1153_v25, %v1113_v33  ;;  %v1238_v48 = vmax.f32 %v1152_v38, 0.0 }
 0x176   : > { %v1115_v28 = vpop.f32.mrf.mxu0  ;;  %v1156_v29 = vpop.f32.mrf.mxu1 }
 0x177   : > { %v1239_v43 = vmax.f32 %v1154_v35, 0.0  ;;  %v1258_v57 = vmul.f32 %v1246_v49, %v1238_v48 }
 0x179   : > { %v1259_v54 = vmul.f32 %v1250_v44, %v1239_v43 }
 0x17b   : > { %v1261_v60 = vadd.f32 %v1259_v54, %v1258_v57 }
 0x190   : > { %v1466_v36 = vpop.f32.mrf.mxu0  ;;  %v1488_v37 = vpop.f32.mrf.mxu1 }
 0x192   : > { %v1467_v41 = vpop.f32.mrf.mxu0  ;;  %v1489_v42 = vpop.f32.mrf.mxu1 }
 0x193   : > { %v1468_v45 = vadd.f32 %v1467_v41, %v1466_v36  ;;  %v1490_v51 = vadd.f32 %v1489_v42, %v1488_v37 }
 0x194   : > { %v1469_v46 = vpop.f32.mrf.mxu0  ;;  %v1491_v47 = vpop.f32.mrf.mxu1 }
 0x195   : > { %v1193_v50 = vadd.f32 %v1468_v45, %v560_v39 }
 0x196   : > { %v1470_v52 = vpop.f32.mrf.mxu0  ;;  %v1492_v53 = vpop.f32.mrf.mxu1 }
 0x197   : > { %v1233_v55 = vadd.f32 %v1490_v51, %v1193_v50 }
 0x199   : > { %v1240_v58 = vmax.f32 %v1233_v55, 0.0 }
 0x19b   : > { %v1260_v59 = vmul.f32 %v1254_v56, %v1240_v58 }
 0x19d   : > { %v1262_v9 = vadd.f32 %v1261_v60, %v1260_v59 }
 0x19f   : > { %1263 = vadd.xlane.f32.xlu1 %v1262_v9 }
 0x228   : > { %v1264_v62 = vpop.xlane.xlu1 %1263 }
 0x229   : > { %v1272_v63 = vadd.f32 %v1447_v61, %v1264_v62 }
 0x22b   : > { %v1273_v0 = vmax.f32 %v1272_v63, 0.0 }
 0x22d   : > { %v1274_v8 = vmin.f32 %v1273_v0, 1.0 }
 0x22f   : > { %1276 = vst.msk [vmem:[%s317_s7] sm:$0xff] %vm1275_vm0, %v1274_v8 }
 0x230 PF: > { %s21_s29 = sadd.s32 1, %s1683_s29  }
 0x231   : > { %p18_p1 = scmp.ge.s32.totalorder %s21_s29, 4  }
 0x233   :  { %20 = sbr.rel (!%p18_p1) target bundleno = 4 (0x4), region = 87 }
 0x238   :  { %1296 = vsyncpa [#allocation4], 1 }
 0x239   :  { %1298 = vsyncpa [#allocation4 + $0x1], 1 }

</bundles_post_ra>
